<compile_context>
chip_gen: v7x
topology: tpu7x:2x2x1
jax: 0.10.0
libtpu: 0.0.40
codegen_flags: <defaults>
</compile_context>

<pallas_src>
import jax
import jax.numpy as jnp
from jax.experimental import pallas as pl
from jax.experimental.pallas import tpu as pltpu

BN_EPS = 1e-5
LANE = 128


def _conv_stats_kernel(xt_ref, w_ref, conv_ref, stats_ref):
    """One (batch, row-block) tile: 3x3 conv as a single K=9*Cin matmul + partial BN stats.

    xt_ref   : (TILE_H+2, W+2, Cin)  row tile of the zero-padded input (1-row halo included)
    w_ref    : (9*Cin, CP)           conv weights in im2col layout, Cout zero-padded to CP
    conv_ref : (TILE_H*W, CP)        conv output tile (f32, lane-dense)
    stats_ref: (2, CP)               row 0 = per-channel sum, row 1 = per-channel sum of squares
    """
    Tp2, Wp, Cin = xt_ref.shape
    T, W = Tp2 - 2, Wp - 2

    x = xt_ref[...]
    # im2col: nine shifted (T*W, Cin) slabs -> one (T*W, 9*Cin) patch matrix
    # (column order kh-major, kw, cin -- matches w_ref's reshape in the wrapper).
    cols = []
    for kh in range(3):
        for kw in range(3):
            cols.append(x[kh:kh + T, kw:kw + W, :].reshape(T * W, Cin))
    patches = jnp.concatenate(cols, axis=1)                        # (T*W, 9*Cin)

    # Single MXU matmul with K = 9*Cin instead of 9 tiny K=Cin matmuls.
    # TODO(synk): cast patches / w_ref to bf16 on v6e/v7x for MXU throughput (keep f32 accum).
    acc = jnp.dot(patches, w_ref[...], preferred_element_type=jnp.float32)   # (T*W, CP)

    conv_ref[...] = acc
    stats_ref[...] = jnp.concatenate(
        [jnp.sum(acc, axis=0, keepdims=True),
         jnp.sum(acc * acc, axis=0, keepdims=True)], axis=0)


def _bn_relu_kernel(conv_ref, scale_ref, shift_ref, out_ref):
    """Pass 2: y = relu(conv * scale + shift) with per-channel (lane) scale / shift."""
    out_ref[...] = jnp.maximum(conv_ref[...] * scale_ref[...] + shift_ref[...], 0.0)


def _pick_tile_h(H, W):
    """Largest divisor of H (<= 8) keeping the row-tile sublane count a multiple of 8."""
    for t in range(min(H, 8), 0, -1):
        if H % t == 0 and (t * W) % 8 == 0:
            return t
    return H


def conv_block_forward(x_nchw, weight_oihw, gamma, beta):
    """ConvBlock forward. x_nchw: (N, Cin, H, W); weight_oihw: (Cout, Cin, 3, 3)."""
    N, Cin, H, W = x_nchw.shape
    Cout = weight_oihw.shape[0]
    CP = ((Cout + LANE - 1) // LANE) * LANE            # lane-dense padded channel count

    T = _pick_tile_h(H, W)
    num_hb = H // T
    rows_tile = T * W
    num_tiles = N * num_hb
    Wp = W + 2

    # ---- plain-XLA glue: NCHW->NHWC, zero pad, halo-row duplication -------------------
    # TODO(synk): fold transpose/pad/halo into the kernel DMA path to drop these extra HBM passes.
    x_nhwc = jnp.transpose(x_nchw, (0, 2, 3, 1)).astype(jnp.float32)
    x_pad = jnp.pad(x_nhwc, ((0, 0), (1, 1), (1, 1), (0, 0)))            # (N, H+2, W+2, Cin)
    row_idx = jnp.arange(num_hb)[:, None] * T + jnp.arange(T + 2)[None, :]
    x_tiles = x_pad[:, row_idx]                                          # (N, num_hb, T+2, Wp, Cin)

    w_mat = jnp.transpose(weight_oihw, (2, 3, 1, 0)).astype(jnp.float32)  # HWIO
    w_mat = w_mat.reshape(9 * Cin, Cout)
    w_mat = jnp.pad(w_mat, ((0, 0), (0, CP - Cout)))                      # (9*Cin, CP)
    gamma_p = jnp.pad(gamma.astype(jnp.float32), (0, CP - Cout))
    beta_p = jnp.pad(beta.astype(jnp.float32), (0, CP - Cout))

    # ---- pass 1: conv + per-tile BN partial stats (fully parallel grid) ----------------
    conv_flat, stats = pl.pallas_call(
        _conv_stats_kernel,
        grid=(N, num_hb),
        in_specs=[
            pl.BlockSpec((None, None, T + 2, Wp, Cin), lambda n, h: (n, h, 0, 0, 0)),
            pl.BlockSpec((9 * Cin, CP), lambda n, h: (0, 0)),
        ],
        out_specs=(
            pl.BlockSpec((rows_tile, CP), lambda n, h: (n * num_hb + h, 0)),
            pl.BlockSpec((None, 2, CP), lambda n, h: (n * num_hb + h, 0, 0)),
        ),
        out_shape=(
            jax.ShapeDtypeStruct((N * H * W, CP), jnp.float32),
            jax.ShapeDtypeStruct((num_tiles, 2, CP), jnp.float32),
        ),
        compiler_params=pltpu.CompilerParams(
            dimension_semantics=("parallel", "parallel"),
            vmem_limit_bytes=32 * 1024 * 1024),
        cost_estimate=pl.CostEstimate(
            flops=2 * N * H * W * 9 * Cin * CP,
            transcendentals=0,
            bytes_accessed=4 * (x_tiles.size + w_mat.size
                                + N * H * W * CP + num_tiles * 2 * CP)),
    )(x_tiles, w_mat)

    # ---- tiny glue: reduce partials -> global train-mode BN stats -> scale/shift -------
    tot = jnp.sum(stats, axis=0)                                   # (2, CP)
    cnt = jnp.float32(N * H * W)
    mean = tot[0] / cnt
    var = jnp.maximum(tot[1] / cnt - mean * mean, 0.0)             # biased variance
    inv_std = jax.lax.rsqrt(var + BN_EPS)
    scale = (gamma_p * inv_std).reshape(1, CP)
    shift = (beta_p - mean * gamma_p * inv_std).reshape(1, CP)
    # TODO(synk): BatchNorm running_mean/running_var momentum updates are not modeled
    # (stateful buffers; they do not affect the train-mode forward output).

    # ---- pass 2: normalize + affine + ReLU ---------------------------------------------
    y_flat = pl.pallas_call(
        _bn_relu_kernel,
        grid=(num_tiles,),
        in_specs=[
            pl.BlockSpec((rows_tile, CP), lambda i: (i, 0)),
            pl.BlockSpec((1, CP), lambda i: (0, 0)),
            pl.BlockSpec((1, CP), lambda i: (0, 0)),
        ],
        out_specs=pl.BlockSpec((rows_tile, CP), lambda i: (i, 0)),
        out_shape=jax.ShapeDtypeStruct((N * H * W, CP), jnp.float32),
        compiler_params=pltpu.CompilerParams(
            dimension_semantics=("parallel",),
            vmem_limit_bytes=32 * 1024 * 1024),
        cost_estimate=pl.CostEstimate(
            flops=3 * N * H * W * CP,
            transcendentals=0,
            bytes_accessed=4 * 2 * N * H * W * CP),
    )(conv_flat, scale, shift)

    # ---- back to NCHW, drop channel padding --------------------------------------------
    y = y_flat.reshape(N, H, W, CP)[..., :Cout]
    return jnp.transpose(y, (0, 3, 1, 2))


def _reference(x_nchw, weight_oihw, gamma, beta):
    """Pure-JAX reference mirroring PyTorch ConvBlock forward (train-mode BN)."""
    conv = jax.lax.conv_general_dilated(
        x_nchw.astype(jnp.float32), weight_oihw.astype(jnp.float32),
        window_strides=(1, 1), padding=((1, 1), (1, 1)),
        dimension_numbers=("NCHW", "OIHW", "NCHW"))
    mean = jnp.mean(conv, axis=(0, 2, 3), keepdims=True)
    var = jnp.mean((conv - mean) ** 2, axis=(0, 2, 3), keepdims=True)
    y = (conv - mean) / jnp.sqrt(var + BN_EPS)
    y = y * gamma.reshape(1, -1, 1, 1) + beta.reshape(1, -1, 1, 1)
    return jnp.maximum(y, 0.0)


if __name__ == "__main__":
    key = jax.random.PRNGKey(0)
    k_x, k_w = jax.random.split(key)

    N, Cin, Cout, H, W = 2, 4, 8, 16, 16

    x = jax.random.normal(k_x, (N, Cin, H, W), dtype=jnp.float32)
    # Deterministic parameter init (synthetic; shapes from nn.Conv2d / nn.BatchNorm2d).
    weight = 0.1 * jax.random.normal(k_w, (Cout, Cin, 3, 3), dtype=jnp.float32)
    gamma = jnp.ones((Cout,), jnp.float32)     # BatchNorm2d default weight init
    beta = jnp.zeros((Cout,), jnp.float32)     # BatchNorm2d default bias init

    out = conv_block_forward(x, weight, gamma, beta)
    out = jax.block_until_ready(out)

    ref = _reference(x, weight, gamma, beta)
    assert out.shape == (N, Cout, H, W)
    assert jnp.allclose(out, ref, atol=1e-4, rtol=1e-4), "mismatch vs reference"

    print("KERNEL_OK")
</pallas_src>

<mosaic_0001>
module attributes {stable_mosaic.version = 11 : i64} {
  func.func @_conv_stats_kernel(%arg0: i32, %arg1: i32, %arg2: memref<1x1x10x18x4xf32, #tpu.memory_space<vmem>>, %arg3: memref<36x128xf32, #tpu.memory_space<vmem>>, %arg4: memref<128x128xf32, #tpu.memory_space<vmem>>, %arg5: memref<1x2x128xf32, #tpu.memory_space<vmem>>) attributes {dimension_semantics = [#tpu.dimension_semantics<parallel>, #tpu.dimension_semantics<parallel>], iteration_bounds = array<i64: 2, 2>, scalar_prefetch = 0 : i64, scratch_operands = 0 : i64, tpu.core_type = #tpu.core_type<tc>, window_params = [{transform_indices = @transform_0, window_bounds = array<i64: 1, 1, 10, 18, 4>}, {pipeline_mode = #tpu.pipeline_mode<synchronous>, transform_indices = @transform_1, window_bounds = array<i64: 36, 128>}, {transform_indices = @transform_2, window_bounds = array<i64: 128, 128>}, {transform_indices = @transform_3, window_bounds = array<i64: 1, 2, 128>}]} {
    %c0 = arith.constant 0 : index
    %c0_0 = arith.constant 0 : index
    %c0_1 = arith.constant 0 : index
    %c0_2 = arith.constant 0 : index
    %c0_3 = arith.constant 0 : index
    %0 = vector.load %arg2[%c0, %c0_0, %c0_1, %c0_2, %c0_3] : memref<1x1x10x18x4xf32, #tpu.memory_space<vmem>>, vector<1x1x10x18x4xf32>
    %1 = vector.shape_cast %0 : vector<1x1x10x18x4xf32> to vector<10x18x4xf32>
    %2 = vector.extract_strided_slice %1 {offsets = [0, 0, 0], sizes = [8, 16, 4], strides = [1, 1, 1]} : vector<10x18x4xf32> to vector<8x16x4xf32>
    %3 = vector.shape_cast %2 : vector<8x16x4xf32> to vector<128x4xf32>
    %4 = vector.extract_strided_slice %1 {offsets = [0, 1, 0], sizes = [8, 16, 4], strides = [1, 1, 1]} : vector<10x18x4xf32> to vector<8x16x4xf32>
    %5 = vector.shape_cast %4 : vector<8x16x4xf32> to vector<128x4xf32>
    %6 = vector.extract_strided_slice %1 {offsets = [0, 2, 0], sizes = [8, 16, 4], strides = [1, 1, 1]} : vector<10x18x4xf32> to vector<8x16x4xf32>
    %7 = vector.shape_cast %6 : vector<8x16x4xf32> to vector<128x4xf32>
    %8 = vector.extract_strided_slice %1 {offsets = [1, 0, 0], sizes = [8, 16, 4], strides = [1, 1, 1]} : vector<10x18x4xf32> to vector<8x16x4xf32>
    %9 = vector.shape_cast %8 : vector<8x16x4xf32> to vector<128x4xf32>
    %10 = vector.extract_strided_slice %1 {offsets = [1, 1, 0], sizes = [8, 16, 4], strides = [1, 1, 1]} : vector<10x18x4xf32> to vector<8x16x4xf32>
    %11 = vector.shape_cast %10 : vector<8x16x4xf32> to vector<128x4xf32>
    %12 = vector.extract_strided_slice %1 {offsets = [1, 2, 0], sizes = [8, 16, 4], strides = [1, 1, 1]} : vector<10x18x4xf32> to vector<8x16x4xf32>
    %13 = vector.shape_cast %12 : vector<8x16x4xf32> to vector<128x4xf32>
    %14 = vector.extract_strided_slice %1 {offsets = [2, 0, 0], sizes = [8, 16, 4], strides = [1, 1, 1]} : vector<10x18x4xf32> to vector<8x16x4xf32>
    %15 = vector.shape_cast %14 : vector<8x16x4xf32> to vector<128x4xf32>
    %16 = vector.extract_strided_slice %1 {offsets = [2, 1, 0], sizes = [8, 16, 4], strides = [1, 1, 1]} : vector<10x18x4xf32> to vector<8x16x4xf32>
    %17 = vector.shape_cast %16 : vector<8x16x4xf32> to vector<128x4xf32>
    %18 = vector.extract_strided_slice %1 {offsets = [2, 2, 0], sizes = [8, 16, 4], strides = [1, 1, 1]} : vector<10x18x4xf32> to vector<8x16x4xf32>
    %19 = vector.shape_cast %18 : vector<8x16x4xf32> to vector<128x4xf32>
    %20 = tpu.concatenate %3, %5, %7, %9, %11, %13, %15, %17, %19 in 1 : vector<128x4xf32>, vector<128x4xf32>, vector<128x4xf32>, vector<128x4xf32>, vector<128x4xf32>, vector<128x4xf32>, vector<128x4xf32>, vector<128x4xf32>, vector<128x4xf32> -> vector<128x36xf32>
    %c0_4 = arith.constant 0 : index
    %c0_5 = arith.constant 0 : index
    %21 = vector.load %arg3[%c0_4, %c0_5] : memref<36x128xf32, #tpu.memory_space<vmem>>, vector<36x128xf32>
    %cst = arith.constant dense<0.000000e+00> : vector<128x128xf32>
    %22 = tpu.matmul %20, %21, %cst {dimension_numbers = #tpu.dot_dimension_numbers<[1], [0], [0], [1], [0, 0, 1, 1], [], []>} : vector<128x36xf32>, vector<36x128xf32>, vector<128x128xf32> -> vector<128x128xf32>
    %c0_6 = arith.constant 0 : index
    %c0_7 = arith.constant 0 : index
    %23 = vector.load %arg4[%c0_6, %c0_7] : memref<128x128xf32, #tpu.memory_space<vmem>>, vector<128x128xf32>
    tpu.vector_store %arg4[%c0_6, %c0_7], %22 {strides = array<i32>} : memref<128x128xf32, #tpu.memory_space<vmem>>, vector<128x128xf32>,
    %cst_8 = arith.constant dense<0.000000e+00> : vector<128xf32>
    %24 = vector.multi_reduction <add>, %22, %cst_8 [0] : vector<128x128xf32> to vector<128xf32>
    %25 = vector.shape_cast %24 : vector<128xf32> to vector<1x128xf32>
    %26 = arith.mulf %22, %22 : vector<128x128xf32>
    %cst_9 = arith.constant dense<0.000000e+00> : vector<128xf32>
    %27 = vector.multi_reduction <add>, %26, %cst_9 [0] : vector<128x128xf32> to vector<128xf32>
    %28 = vector.shape_cast %27 : vector<128xf32> to vector<1x128xf32>
    %29 = tpu.concatenate %25, %28 in 0 : vector<1x128xf32>, vector<1x128xf32> -> vector<2x128xf32>
    %c0_10 = arith.constant 0 : index
    %c0_11 = arith.constant 0 : index
    %c0_12 = arith.constant 0 : index
    %30 = vector.load %arg5[%c0_10, %c0_11, %c0_12] : memref<1x2x128xf32, #tpu.memory_space<vmem>>, vector<1x2x128xf32>
    %31 = vector.shape_cast %30 : vector<1x2x128xf32> to vector<2x128xf32>
    %32 = vector.shape_cast %29 : vector<2x128xf32> to vector<1x2x128xf32>
    tpu.vector_store %arg5[%c0_10, %c0_11, %c0_12], %32 {strides = array<i32>} : memref<1x2x128xf32, #tpu.memory_space<vmem>>, vector<1x2x128xf32>,
    return
  }
  func.func @transform_0(%arg0: i32, %arg1: i32) -> (i32, i32, i32, i32, i32) {
    %c0_i32 = arith.constant 0 : i32
    %c0_i32_0 = arith.constant 0 : i32
    %c0_i32_1 = arith.constant 0 : i32
    %c0_i32_2 = arith.constant 0 : i32
    return %arg0, %arg1, %c0_i32, %c0_i32_0, %c0_i32_1 : i32, i32, i32, i32, i32
  }
  func.func @transform_1(%arg0: i32, %arg1: i32) -> (i32, i32) {
    %c0_i32 = arith.constant 0 : i32
    %c0_i32_0 = arith.constant 0 : i32
    %c0_i32_1 = arith.constant 0 : i32
    return %c0_i32, %c0_i32_0 : i32, i32
  }
  func.func @transform_2(%arg0: i32, %arg1: i32) -> (i32, i32) {
    %c2_i32 = arith.constant 2 : i32
    %0 = arith.muli %arg0, %c2_i32 : i32
    %1 = arith.addi %0, %arg1 : i32
    %c0_i32 = arith.constant 0 : i32
    %c0_i32_0 = arith.constant 0 : i32
    return %1, %c0_i32 : i32, i32
  }
  func.func @transform_3(%arg0: i32, %arg1: i32) -> (i32, i32, i32) {
    %c2_i32 = arith.constant 2 : i32
    %0 = arith.muli %arg0, %c2_i32 : i32
    %1 = arith.addi %0, %arg1 : i32
    %c0_i32 = arith.constant 0 : i32
    %c0_i32_0 = arith.constant 0 : i32
    %c0_i32_1 = arith.constant 0 : i32
    return %1, %c0_i32, %c0_i32_0 : i32, i32, i32
  }
}

</mosaic_0001>

<bundles_post_ra>
// kernel: tpu_custom_call.1
= control target key start
LH: loop header
LB: loop body
LE: loop exit
PB: predicated region body
PF: predicated region fallthrough
CT: control target
= control target key end

     0   :  { %9 = vsyncpa [#allocation3], 0  ;;  %s2441_s0 = inlined_call_operand.vmem [shape: f32[2,2,10,18,4], index: 0, kind: input, shape index: {}]   ;;  %s2442_s1 = inlined_call_operand.vmem [shape: f32[36,128], index: 1, kind: input, shape index: {}]   ;;  %s2443_s2 = inlined_call_operand.hbm [shape: f32[512,128], index: 2, kind: output, shape index: {0}]   ;;  %s2444_s3 = inlined_call_operand.hbm [shape: f32[4,2,128], index: 3, kind: output, shape index: {1}]  }
   0x1   :  { %11 = vsyncpa [#allocation3 + $0x1], 0 }
   0x2   :  { %12 = vsyncpa [#allocation5], 0 }
   0x3   :  { %14 = vsyncpa [#allocation5 + $0x1], 0  ;;  %s1689_s12 = smov 0   ;;  %s1691_s13 = smov 0  }
   0x4   :  { %s1693_s14 = smov 0   ;;  %s1695_s15 = smov 0  }
   0x5   :  { %s1697_s16 = smov 0   ;;  %s1699_s17 = smov 0  }
   0x6   :  { %s1701_s18 = smov 0   ;;  %s1703_s19 = smov 0  }
   0x7 LB: > { %s1335_s20 = sadd.s32 4294967295, %s1656_s19   ;;  %s29_s21 = sadd.s32 1, %s1648_s17  ;;  %s1656_s19 = sphi %s1703_s19, %s20_s19   ;;  %s1652_s18 = sphi %s1701_s18, %s2453_s18   ;;  %s1648_s17 = sphi %s1699_s17, %s2452_s17   ;;  %s1644_s16 = sphi %s1697_s16, %s2451_s16   ;;  %s1640_s15 = sphi %s1695_s15, %s2450_s15   ;;  %s1636_s14 = sphi %s1693_s14, %s2449_s14   ;;  %s1632_s13 = sphi %s1691_s13, %s2448_s13   ;;  %s1628_s12 = sphi %s1689_s12, %s2447_s12  }
   0x8   : > { %s32_s22 = sadd.s32 1, %s1652_s18  ;;  %p30_p0 = scmp.ge.s32.totalorder %s29_s21, 2 }
   0x9   : > { %s1337_s23 = sshll.u32 %s1652_s18, 1  ;;  %s1336_s24 = sadd.s32 4294967294, %s1656_s19  }
   0xa   : > { %s86_s25 = sadd.s32 %s1648_s17, %s1337_s23  ;;  %s2455_s21 = smov (%p30_p0, %s29_s21), 0 }
   0xb   : > { %s2457_s22 = smov (!%p30_p0, %s32_s22), %s1652_s18  ;;  %p102_p1 = scmp.ne.s32.totalorder %s1636_s14, %s1632_s13 }
   0xc   : > { %p103_p2 = scmp.eq.s32.totalorder %s1335_s20, 3  ;;  %p34_p3 = scmp.ge.s32.totalorder %s2457_s22, 2 }
   0xd   : > { %p108_p4 = scmp.ne.s32.totalorder %s1632_s13, %s1628_s12  ;;  %p109_p6 = scmp.eq.s32.totalorder %s1336_s24, 3 }
   0xe   : > { %p1742_p5 = por %p103_p2, %p102_p1  ;;  %s2459_s22 = smov (%p34_p3, %s2457_s22), 0 }
   0xf   : > { %p1748_p7 = por %p109_p6, %p108_p4  ;;  %p1343_p8 = scmp.ge.s32.totalorder %s1656_s19, 1 }
  0x10   : > { %s1338_s28 = sshll.u32 %s2459_s22, 1  ;;  %p172_p9 = scmp.lt.s32.totalorder %s1656_s19, 5 }
  0x11   : > { %s88_s29 = sadd.s32 %s1338_s28, %s2455_s21  ;;  %s92_s30 = sadd.s32 1, %s1636_s14 }
  0x12   : > { %s89_s4 = ssub.s32 %s86_s25, %s88_s29  ;;  %p173_p10 = pnand %p1343_p8, %p172_p9 }
  0x13   : > { %p90_p11 = scmp.eq.s32.totalorder %s89_s4, 0  ;;  %p205_p12 = scmp.lt.s32.totalorder (!%p173_p10), %s1644_s16, 1  ;;  %vm314_vm0 = vcmask (!%p173_p10), 1045504   ;;  %vm273_vm1 = vcmask (!%p173_p10), 1046528   ;;  %v901_v28 = vld [vmem:[%s2442_s1] sm:$0xff] (!%p173_p10)  ;;  %v902_v29 = vld [vmem:[%s2442_s1 + $0x8] sm:$0xff] (!%p173_p10) }
  0x14   : > { %176 = sbr.rel (%p173_p10) target bundleno = 662 (0x296), region = 28  ;;  %p207_p13 = scmp.lt.s32.totalorder (!%p173_p10), %s1640_s15, 1  ;;  %v1429_v30 = vpack.c.bf16 (!%p173_p10), %v902_v29, %v901_v28  ;;  %v903_v33 = vld [vmem:[%s2442_s1 + $0x10] sm:$0xff] (!%p173_p10)  ;;  %v904_v34 = vld [vmem:[%s2442_s1 + $0x18] sm:$0xff] (!%p173_p10)  ;;  %v905_v38 = vld [vmem:[%s2442_s1 + $0x20] sm:$0xf] (!%p173_p10) }
  0x15   : > { %s1758_s5 = scalar_select %p90_p11, %s1636_s14, %s92_s30  }
  0x16   : > { %s1658_s25 = smov (!%p173_p10), 12   ;;  %s1659_s28 = smov (!%p173_p10), 8   ;;  %1430 = vmatprep.subr.bf16.mxu0 (!%p173_p10), %v1429_v30  ;;  %1437 = vmatprep.subr.bf16.mxu1 (!%p173_p10), %v1429_v30  ;;  %v1433_v36 = vpack.c.bf16 (!%p173_p10), %v904_v34, %v903_v33  ;;  %vm955_vm2 = vcmask (!%p173_p10), 1043456   ;;  %vm765_vm3 = vcmask (!%p173_p10), 31744   ;;  %vm782_vm4 = vcmask (!%p173_p10), 64512  }
  0x17   : > { %s1660_s29 = smov (!%p173_p10), 4   ;;  %s1661_s30 = smov (!%p173_p10), 16   ;;  %1432 = vmatpush3.bf16.msra.mxu0 (!%p173_p10), %v1429_v30  ;;  %1440 = vmatpush3.bf16.msra.mxu1 (!%p173_p10), %v1429_v30  ;;  %vm799_vm5 = vcmask (!%p173_p10), 97280   ;;  %vm816_vm6 = vcmask (!%p173_p10), 130048   ;;  %vm833_vm7 = vcmask (!%p173_p10), 162816   ;;  %vm850_vm8 = vcmask (!%p173_p10), 195584  }
  0x18   : > { %s1662_s4 = smov (!%p173_p10), 20   ;;  %1434 = vmatprep.subr.bf16.mxu0 (!%p173_p10), %v1433_v36  ;;  %1438 = vmatprep.subr.bf16.mxu1 (!%p173_p10), %v1433_v36  ;;  %vm867_vm9 = vcmask (!%p173_p10), 228352   ;;  %vm884_vm10 = vcmask (!%p173_p10), 261120   ;;  %vm906_vm11 = vcmask (!%p173_p10), 293888  }
  0x1b   : > { %s206_s6 = scalar_select %p205_p12, %s1644_s16, 1  ;;  %1436 = vmatpush3.bf16.msra.mxu0 %v1433_v36  ;;  %1441 = vmatpush3.bf16.msra.mxu1 %v1433_v36 }
  0x1c   : > { %s208_s7 = scalar_select %p207_p13, %s1640_s15, 1  ;;  %1403 = vmatprep.subr.msk.mxu0 %vm955_vm2, %v905_v38  ;;  %1439 = vmatprep.subr.msk.mxu1 %vm955_vm2, %v905_v38 }
  0x1d   : > { %s1444_s8 = smul.u32 60, %s206_s6 }
  0x1e   : > { %s1443_s9 = smul.u32 30, %s208_s7  ;;  %s1664_s7 = smov 28  }
  0x1f   : > { %1404 = vmatpush3.msk.msra.mxu0 %vm955_vm2, %v905_v38  ;;  %1442 = vmatpush3.msk.msra.mxu1 %vm955_vm2, %v905_v38 }
  0x20   : > { %s211_s10 = sadd.s32 %s1444_s8, %s1443_s9  ;;  %s1666_s8 = smov [#allocation2]  }
  0x21   : > { %s1346_s11 = sshll.u32 %s211_s10, 3  ;;  %s1663_s10 = smov 24  }
  0x22   : > { %s1767_s24 = scalar_lea.vmem %s2441_s0, %s1346_s11  ;;  %s1665_s11 = smov 32  }
  0x23   : > { %v1770_v0 = vld [vmem:[%s1767_s24 + $0x20] sm:$0xff]  ;;  %v1773_v1 = vld [vmem:[%s1767_s24 + $0x18] sm:$0xff]  ;;  %v1783_v3 = vld [vmem:[%s1767_s24 + $0x8] sm:$0xff]  ;;  %s1534_s9 = sshll.u32 %s1666_s8, 4  ;;  %s1535_s9 = int_to_ptr.vmem [resolvable:$false] %s1534_s9 }
  0x24   : > { %v1776_v2 = vld [vmem:[%s1767_s24] sm:$0xff]  ;;  %479 = vrot.lane.b32.xlu1 %v1770_v0, %s1658_s25  ;;  %477 = vrot.lane.b32.xlu0 %v1773_v1, %s1658_s25  ;;  %v221_v6 = vld [vmem:[%s1767_s24 + $0x10] sm:$0x3]  ;;  %v316_v7 = vrot.slane %v1783_v3, 2  ;;  %v275_v8 = vrot.slane %v1783_v3, 1  ;;  %v279_v15 = vrot.slane %v1773_v1, 1 }
  0x25   : > { %v315_v4 = vrot.slane %v1776_v2, 2  ;;  %v274_v5 = vrot.slane %v1776_v2, 1  ;;  %v318_v9 = vrot.slane %v221_v6, 2  ;;  %v277_v10 = vrot.slane %v221_v6, 1  ;;  %v224_v17 = vld [vmem:[%s1767_s24 + $0x28] sm:$0x3] }
  0x26   : > { %v280_v16 = vrot.slane %v1770_v0, 1  ;;  %v320_v19 = vrot.slane %v1773_v1, 2  ;;  %v321_v20 = vrot.slane %v1770_v0, 2  ;;  %v282_v21 = vrot.slane %v224_v17, 1  ;;  %v1813_v25 = vld [vmem:[%s1767_s24 + $0x30] sm:$0xff]  ;;  %v1817_v27 = vld [vmem:[%s1767_s24 + $0x38] sm:$0xff] }
  0x27   : > { %v317_v11 = vsel %vm314_vm0, %v315_v4, %v316_v7  ;;  %v276_v12 = vsel %vm273_vm1, %v274_v5, %v275_v8  ;;  %v319_v13 = vsel %vm314_vm0, %v316_v7, %v318_v9  ;;  %v278_v14 = vsel %vm273_vm1, %v275_v8, %v277_v10  ;;  %v227_v37 = vld [vmem:[%s1767_s24 + $0x40] sm:$0x3]  ;;  %v1864_v46 = vld [vmem:[%s1767_s24 + $0x48] sm:$0xff]  ;;  %v1867_v47 = vld [vmem:[%s1767_s24 + $0x50] sm:$0xff] }
  0x28   : > { %429 = vrot.lane.b32.xlu1 %v317_v11, %s1659_s28  ;;  %381 = vrot.lane.b32.xlu0 %v276_v12, %s1660_s29  ;;  %v281_v18 = vsel %vm273_vm1, %v279_v15, %v280_v16  ;;  %v322_v22 = vsel %vm314_vm0, %v320_v19, %v321_v20  ;;  %v283_v23 = vsel %vm273_vm1, %v280_v16, %v282_v21  ;;  %v323_v24 = vrot.slane %v224_v17, 2  ;;  %v230_v51 = vld [vmem:[%s1767_s24 + $0x58] sm:$0x3]  ;;  %v1899_v59 = vld [vmem:[%s1767_s24 + $0x60] sm:$0xff] }
  0x29   : > { %v284_v31 = vrot.slane %v1813_v25, 1  ;;  %v285_v32 = vrot.slane %v1817_v27, 1  ;;  %v325_v39 = vrot.slane %v1813_v25, 2  ;;  %v326_v40 = vrot.slane %v1817_v27, 2  ;;  %v1902_v60 = vld [vmem:[%s1767_s24 + $0x68] sm:$0xff]  ;;  %v1939_v17 = vld [vmem:[%s1767_s24 + $0x80] sm:$0xff] }
  0x2a   : > { %v324_v26 = vsel %vm314_vm0, %v321_v20, %v323_v24  ;;  %v287_v41 = vrot.slane %v227_v37, 1  ;;  %v328_v44 = vrot.slane %v227_v37, 2  ;;  %v289_v48 = vrot.slane %v1864_v46, 1  ;;  %v233_v4 = vld [vmem:[%s1767_s24 + $0x70] sm:$0x3] }
  0x2b   : > { %v286_v35 = vsel %vm273_vm1, %v284_v31, %v285_v32  ;;  %v327_v42 = vsel %vm314_vm0, %v325_v39, %v326_v40  ;;  %v290_v49 = vrot.slane %v1867_v47, 1  ;;  %v330_v52 = vrot.slane %v1864_v46, 2 }
  0x2c   : > { %431 = vrot.lane.b32.xlu1 %v319_v13, %s1659_s28  ;;  %383 = vrot.lane.b32.xlu0 %v278_v14, %s1660_s29  ;;  %v288_v43 = vsel %vm273_vm1, %v285_v32, %v287_v41  ;;  %v329_v45 = vsel %vm314_vm0, %v326_v40, %v328_v44  ;;  %v331_v53 = vrot.slane %v1867_v47, 2  ;;  %v292_v54 = vrot.slane %v230_v51, 1  ;;  %v1936_v14 = vld [vmem:[%s1767_s24 + $0x78] sm:$0xff] }
  0x2d   : > { %v291_v50 = vsel %vm273_vm1, %v289_v48, %v290_v49  ;;  %v333_v57 = vrot.slane %v230_v51, 2  ;;  %v294_v61 = vrot.slane %v1899_v59, 1  ;;  %v295_v62 = vrot.slane %v1902_v60, 1 }
  0x2e   : > { %v332_v55 = vsel %vm314_vm0, %v330_v52, %v331_v53  ;;  %v293_v56 = vsel %vm273_vm1, %v290_v49, %v292_v54  ;;  %v335_v5 = vrot.slane %v1899_v59, 2  ;;  %v336_v6 = vrot.slane %v1902_v60, 2  ;;  %v1986_v49 = vld [vmem:[%s1767_s24 + $0x90] sm:$0xff]  ;;  %v1994_v52 = vld [vmem:[%s1767_s24 + $0x98] sm:$0xff] }
  0x2f   : > { %v334_v58 = vsel %vm314_vm0, %v331_v53, %v333_v57  ;;  %v296_v63 = vsel %vm273_vm1, %v294_v61, %v295_v62  ;;  %v297_v7 = vrot.slane %v233_v4, 1  ;;  %v338_v10 = vrot.slane %v233_v4, 2 }
  0x30   : > { %385 = vrot.lane.b32.xlu1 %v281_v18, %s1660_s29  ;;  %525 = vrot.lane.b32.xlu0 %v281_v18, %s1661_s30  ;;  %v337_v8 = vsel %vm314_vm0, %v335_v5, %v336_v6  ;;  %v299_v18 = vrot.slane %v1936_v14, 1  ;;  %v300_v19 = vrot.slane %v1939_v17, 1  ;;  %v340_v28 = vrot.slane %v1936_v14, 2 }
  0x31   : > { %v298_v9 = vsel %vm273_vm1, %v295_v62, %v297_v7  ;;  %v339_v11 = vsel %vm314_vm0, %v336_v6, %v338_v10  ;;  %v341_v29 = vrot.slane %v1939_v17, 2  ;;  %v304_v57 = vrot.slane %v1986_v49, 1 }
  0x33   : > { %v342_v33 = vsel %vm314_vm0, %v340_v28, %v341_v29 }
  0x34   : > { %573 = vrot.lane.b32.xlu1 %v322_v22, %s1662_s4  ;;  %527 = vrot.lane.b32.xlu0 %v283_v23, %s1661_s30 }
  0x38   : > { %433 = vrot.lane.b32.xlu1 %v322_v22, %s1659_s28  ;;  %387 = vrot.lane.b32.xlu0 %v283_v23, %s1660_s29  ;;  %v301_v22 = vsel %vm273_vm1, %v299_v18, %v300_v19 }
  0x3c   : > { %621 = vrot.lane.b32.xlu1 %v1813_v25, %s1663_s10  ;;  %575 = vrot.lane.b32.xlu0 %v324_v26, %s1662_s4 }
  0x40   : > { %481 = vrot.lane.b32.xlu1 %v1813_v25, %s1658_s25  ;;  %435 = vrot.lane.b32.xlu0 %v324_v26, %s1659_s28  ;;  %v236_v26 = vld [vmem:[%s1767_s24 + $0x88] sm:$0x3] }
  0x41   : > { %v302_v30 = vrot.slane %v236_v26, 1  ;;  %v343_v37 = vrot.slane %v236_v26, 2 }
  0x43   : > { %v303_v34 = vsel %vm273_vm1, %v300_v19, %v302_v30  ;;  %v344_v40 = vsel %vm314_vm0, %v341_v29, %v343_v37 }
  0x44   : > { %669 = vrot.lane.b32.xlu1 %v286_v35, %s1664_s7  ;;  %623 = vrot.lane.b32.xlu0 %v1817_v27, %s1663_s10 }
  0x48   : > { %529 = vrot.lane.b32.xlu1 %v286_v35, %s1661_s30  ;;  %483 = vrot.lane.b32.xlu0 %v1817_v27, %s1658_s25 }
  0x4c   : > { %717 = vrot.lane.b32.xlu1 %v327_v42, %s1665_s11  ;;  %671 = vrot.lane.b32.xlu0 %v288_v43, %s1664_s7 }
  0x50   : > { %531 = vrot.lane.b32.xlu1 %v288_v43, %s1661_s30  ;;  %389 = vrot.lane.b32.xlu0 %v286_v35, %s1660_s29 }
  0x54   : > { %719 = vrot.lane.b32.xlu1 %v329_v45, %s1665_s11  ;;  %577 = vrot.lane.b32.xlu0 %v327_v42, %s1662_s4 }
  0x58   : > { %437 = vrot.lane.b32.xlu1 %v327_v42, %s1659_s28  ;;  %391 = vrot.lane.b32.xlu0 %v288_v43, %s1660_s29 }
  0x5c   : > { %625 = vrot.lane.b32.xlu1 %v1864_v46, %s1663_s10  ;;  %579 = vrot.lane.b32.xlu0 %v329_v45, %s1662_s4 }
  0x60   : > { %485 = vrot.lane.b32.xlu1 %v1864_v46, %s1658_s25  ;;  %439 = vrot.lane.b32.xlu0 %v329_v45, %s1659_s28 }
  0x64   : > { %673 = vrot.lane.b32.xlu1 %v291_v50, %s1664_s7  ;;  %627 = vrot.lane.b32.xlu0 %v1867_v47, %s1663_s10 }
  0x68   : > { %533 = vrot.lane.b32.xlu1 %v291_v50, %s1661_s30  ;;  %487 = vrot.lane.b32.xlu0 %v1867_v47, %s1658_s25 }
  0x6c   : > { %721 = vrot.lane.b32.xlu1 %v332_v55, %s1665_s11  ;;  %675 = vrot.lane.b32.xlu0 %v293_v56, %s1664_s7 }
  0x70   : > { %535 = vrot.lane.b32.xlu1 %v293_v56, %s1661_s30  ;;  %393 = vrot.lane.b32.xlu0 %v291_v50, %s1660_s29 }
  0x74   : > { %723 = vrot.lane.b32.xlu1 %v334_v58, %s1665_s11  ;;  %581 = vrot.lane.b32.xlu0 %v332_v55, %s1662_s4 }
  0x78   : > { %441 = vrot.lane.b32.xlu1 %v332_v55, %s1659_s28  ;;  %395 = vrot.lane.b32.xlu0 %v293_v56, %s1660_s29 }
  0x7c   : > { %629 = vrot.lane.b32.xlu1 %v1899_v59, %s1663_s10  ;;  %583 = vrot.lane.b32.xlu0 %v334_v58, %s1662_s4 }
  0x80   : > { %489 = vrot.lane.b32.xlu1 %v1899_v59, %s1658_s25  ;;  %443 = vrot.lane.b32.xlu0 %v334_v58, %s1659_s28  ;;  %v305_v58 = vrot.slane %v1994_v52, 1 }
  0x82   : > { %v306_v5 = vsel %vm273_vm1, %v304_v57, %v305_v58 }
  0x84   : > { %677 = vrot.lane.b32.xlu1 %v296_v63, %s1664_s7  ;;  %631 = vrot.lane.b32.xlu0 %v1902_v60, %s1663_s10 }
  0x88   : > { %537 = vrot.lane.b32.xlu1 %v296_v63, %s1661_s30  ;;  %491 = vrot.lane.b32.xlu0 %v1902_v60, %s1658_s25 }
  0x8c   : > { %725 = vrot.lane.b32.xlu1 %v337_v8, %s1665_s11  ;;  %679 = vrot.lane.b32.xlu0 %v298_v9, %s1664_s7 }
  0x90   : > { %539 = vrot.lane.b32.xlu1 %v298_v9, %s1661_s30  ;;  %397 = vrot.lane.b32.xlu0 %v296_v63, %s1660_s29 }
  0x94   : > { %727 = vrot.lane.b32.xlu1 %v339_v11, %s1665_s11  ;;  %585 = vrot.lane.b32.xlu0 %v337_v8, %s1662_s4 }
  0x96   : > { %v1931_v12 = vpop.permute.xlu1 %479  ;;  %v478_v13 = vpop.permute.xlu0 %477 }
  0x98   : > { %445 = vrot.lane.b32.xlu1 %v337_v8, %s1659_s28  ;;  %399 = vrot.lane.b32.xlu0 %v298_v9, %s1660_s29  ;;  %v239_v9 = vld [vmem:[%s1767_s24 + $0xa0] sm:$0x3] }
  0x99   : > { %v348_v29 = vrot.slane %v239_v9, 2 }
  0x9a   : > { %v430_v15 = vpop.permute.xlu1 %429  ;;  %v382_v16 = vpop.permute.xlu0 %381 }
  0x9b   : > { %v766_v43 = vsel %vm765_vm3, %v1776_v2, %v382_v16  ;;  %v307_v16 = vrot.slane %v239_v9, 1 }
  0x9c   : > { %633 = vrot.lane.b32.xlu1 %v1936_v14, %s1663_s10  ;;  %587 = vrot.lane.b32.xlu0 %v339_v11, %s1662_s4  ;;  %v783_v48 = vsel %vm782_vm4, %v766_v43, %v430_v15  ;;  %v345_v15 = vrot.slane %v1986_v49, 2  ;;  %v2061_v43 = vld [vmem:[%s1767_s24 + $0xa8] sm:$0xff] }
  0x9d   : > { %v800_v2 = vsel %vm799_vm5, %v783_v48, %v478_v13 }
  0x9e   : > { %v1946_v20 = vpop.permute.xlu1 %431  ;;  %v384_v21 = vpop.permute.xlu0 %383 }
  0x9f   : > { %v767_v54 = vsel %vm765_vm3, %v1783_v3, %v384_v21 }
  0xa0   : > { %493 = vrot.lane.b32.xlu1 %v1936_v14, %s1658_s25  ;;  %447 = vrot.lane.b32.xlu0 %v339_v11, %s1659_s28  ;;  %v784_v3 = vsel %vm782_vm4, %v767_v54, %v1946_v20 }
  0xa1   : > { %v801_v6 = vsel %vm799_vm5, %v784_v3, %v1931_v12  ;;  %v346_v12 = vrot.slane %v1994_v52, 2 }
  0xa2   : > { %v1952_v23 = vpop.permute.xlu1 %385  ;;  %v526_v24 = vpop.permute.xlu0 %525 }
  0xa3   : > { %v817_v53 = vsel %vm816_vm6, %v800_v2, %v526_v24  ;;  %v308_v24 = vsel %vm273_vm1, %v305_v58, %v307_v16  ;;  %v2070_v2 = vld [vmem:[%s1767_s24 + $0xb0] sm:$0xff] }
  0xa4   : > { %681 = vrot.lane.b32.xlu1 %v301_v22, %s1664_s7  ;;  %635 = vrot.lane.b32.xlu0 %v1939_v17, %s1663_s10 }
  0xa6   : > { %v574_v31 = vpop.permute.xlu1 %573  ;;  %v528_v32 = vpop.permute.xlu0 %527 }
  0xa7   : > { %v834_v55 = vsel %vm833_vm7, %v817_v53, %v574_v31  ;;  %v818_v10 = vsel %vm816_vm6, %v801_v6, %v528_v32  ;;  %v349_v32 = vsel %vm314_vm0, %v346_v12, %v348_v29  ;;  %v310_v53 = vrot.slane %v2070_v2, 1 }
  0xa8   : > { %541 = vrot.lane.b32.xlu1 %v301_v22, %s1661_s30  ;;  %495 = vrot.lane.b32.xlu0 %v1939_v17, %s1658_s25 }
  0xaa   : > { %v1965_v35 = vpop.permute.xlu1 %433  ;;  %v1967_v36 = vpop.permute.xlu0 %387 }
  0xab   : > { %v769_v57 = vsel %vm765_vm3, %v1770_v0, %v1967_v36  ;;  %v242_v0 = vld [vmem:[%s1767_s24 + $0xb8] sm:$0x3] }
  0xac   : > { %729 = vrot.lane.b32.xlu1 %v342_v33, %s1665_s11  ;;  %683 = vrot.lane.b32.xlu0 %v303_v34, %s1664_s7  ;;  %v312_v6 = vrot.slane %v242_v0, 1 }
  0xae   : > { %v622_v38 = vpop.permute.xlu1 %621  ;;  %v576_v39 = vpop.permute.xlu0 %575 }
  0xaf   : > { %v851_v56 = vsel %vm850_vm8, %v834_v55, %v622_v38  ;;  %v835_v11 = vsel %vm833_vm7, %v818_v10, %v576_v39  ;;  %v768_v39 = vsel %vm765_vm3, %v1773_v1, %v1952_v23 }
  0xb0   : > { %543 = vrot.lane.b32.xlu1 %v303_v34, %s1661_s30  ;;  %401 = vrot.lane.b32.xlu0 %v301_v22, %s1660_s29  ;;  %v347_v22 = vsel %vm314_vm0, %v345_v15, %v346_v12  ;;  %v313_v15 = vsel %vm273_vm1, %v310_v53, %v312_v6 }
  0xb2   : > { %v1974_v41 = vpop.permute.xlu1 %481  ;;  %v1976_v42 = vpop.permute.xlu0 %435 }
  0xb3   : > { %v786_v58 = vsel %vm782_vm4, %v769_v57, %v1976_v42 }
  0xb4   : > { %731 = vrot.lane.b32.xlu1 %v344_v40, %s1665_s11  ;;  %589 = vrot.lane.b32.xlu0 %v342_v33, %s1662_s4 }
  0xb6   : > { %v670_v44 = vpop.permute.xlu1 %669  ;;  %v624_v45 = vpop.permute.xlu0 %623 }
  0xb7   : > { %v868_v61 = vsel %vm867_vm9, %v851_v56, %v670_v44  ;;  %v852_v13 = vsel %vm850_vm8, %v835_v11, %v624_v45 }
  0xb8   : > { %449 = vrot.lane.b32.xlu1 %v342_v33, %s1659_s28  ;;  %403 = vrot.lane.b32.xlu0 %v303_v34, %s1660_s29 }
  0xba   : > { %v1989_v50 = vpop.permute.xlu1 %529  ;;  %v1991_v51 = vpop.permute.xlu0 %483 }
  0xbc   : > { %637 = vrot.lane.b32.xlu1 %v1986_v49, %s1663_s10  ;;  %591 = vrot.lane.b32.xlu0 %v344_v40, %s1662_s4 }
  0xbe   : > { %v718_v62 = vpop.permute.xlu1 %717  ;;  %v672_v63 = vpop.permute.xlu0 %671 }
  0xbf   : > { %v885_v4 = vsel %vm884_vm10, %v868_v61, %v718_v62  ;;  %v869_v18 = vsel %vm867_vm9, %v852_v13, %v672_v63  ;;  %v803_v62 = vsel %vm799_vm5, %v786_v58, %v1991_v51  ;;  %v351_v51 = vrot.slane %v2070_v2, 2  ;;  %v245_v58 = vld [vmem:[%s1767_s24 + $0xd0] sm:$0x3] }
  0xc0   : > { %497 = vrot.lane.b32.xlu1 %v1986_v49, %s1658_s25  ;;  %451 = vrot.lane.b32.xlu0 %v344_v40, %s1659_s28  ;;  %v785_v40 = vsel %vm782_vm4, %v768_v39, %v1965_v35 }
  0xc1   : > { %1405 = vmatprep.mubr.msk.f32.mxu0 %vm906_vm11, %v885_v4  ;;  %v802_v44 = vsel %vm799_vm5, %v785_v40, %v1974_v41  ;;  %v309_v41 = vrot.slane %v2061_v43, 1 }
  0xc2   : > { %v2017_v7 = vpop.permute.xlu1 %531  ;;  %v2019_v8 = vpop.permute.xlu0 %389  ;;  %v819_v1 = vsel %vm816_vm6, %v802_v44, %v1989_v50  ;;  %v244_v44 = vld [vmem:[%s1767_s24 + $0xc8] sm:$0xff] }
  0xc3   : > { %v311_v61 = vsel %vm273_vm1, %v309_v41, %v310_v53  ;;  %v820_v36 = vsel %vm816_vm6, %v803_v62, %v2017_v7  ;;  %v364_v62 = vrot.slane %v244_v44, 2 }
  0xc4   : > { %685 = vrot.lane.b32.xlu1 %v306_v5, %s1664_s7  ;;  %639 = vrot.lane.b32.xlu0 %v1994_v52, %s1663_s10 }
  0xc6   : > { %v720_v19 = vpop.permute.xlu1 %719  ;;  %v578_v20 = vpop.permute.xlu0 %577 }
  0xc7   : > { %v886_v21 = vsel %vm884_vm10, %v869_v18, %v720_v19  ;;  %v836_v23 = vsel %vm833_vm7, %v819_v1, %v578_v20  ;;  %v353_v18 = vrot.slane %v242_v0, 2  ;;  %v361_v0 = vrot.slane %v245_v58, 1 }
  0xc8   : > { %545 = vrot.lane.b32.xlu1 %v306_v5, %s1661_s30  ;;  %499 = vrot.lane.b32.xlu0 %v1994_v52, %s1658_s25 }
  0xc9   : > { %1406 = vmatmul.mubr.msk.f32.vlgmr.msra.gmra.mrb[0].mxu0 %vm906_vm11, %v886_v21  ;;  %v354_v21 = vsel %vm314_vm0, %v351_v51, %v353_v18  ;;  %v247_v18 = vld [vmem:[%s1767_s24 + $0xe0] sm:$0xff] }
  0xca   : > { %v2038_v26 = vpop.permute.xlu1 %437  ;;  %v2040_v28 = vpop.permute.xlu0 %391 }
  0xcc   : > { %733 = vrot.lane.b32.xlu1 %v347_v22, %s1665_s11  ;;  %687 = vrot.lane.b32.xlu0 %v308_v24, %s1664_s7 }
  0xce   : > { %v626_v30 = vpop.permute.xlu1 %625  ;;  %v580_v31 = vpop.permute.xlu0 %579 }
  0xcf   : > { %v853_v35 = vsel %vm850_vm8, %v836_v23, %v626_v30  ;;  %v837_v4 = vsel %vm833_vm7, %v820_v36, %v580_v31  ;;  %v770_v31 = vsel %vm765_vm3, %v1813_v25, %v2019_v8  ;;  %v359_v23 = vrot.slane %v244_v44, 1 }
  0xd0   : > { %547 = vrot.lane.b32.xlu1 %v308_v24, %s1661_s30  ;;  %405 = vrot.lane.b32.xlu0 %v306_v5, %s1660_s29  ;;  %v350_v5 = vrot.slane %v2061_v43, 2 }
  0xd2   : > { %v2047_v33 = vpop.permute.xlu1 %485  ;;  %v2049_v34 = vpop.permute.xlu0 %439  ;;  %v352_v13 = vsel %vm314_vm0, %v350_v5, %v351_v51  ;;  %v362_v5 = vsel %vm273_vm1, %v359_v23, %v361_v0 }
  0xd4   : > { %735 = vrot.lane.b32.xlu1 %v349_v32, %s1665_s11  ;;  %593 = vrot.lane.b32.xlu0 %v347_v22, %s1662_s4 }
  0xd6   : > { %v674_v37 = vpop.permute.xlu1 %673  ;;  %v628_v38 = vpop.permute.xlu0 %627 }
  0xd7   : > { %v870_v54 = vsel %vm867_vm9, %v853_v35, %v674_v37  ;;  %v854_v42 = vsel %vm850_vm8, %v837_v4, %v628_v38  ;;  %v243_v37 = vld [vmem:[%s1767_s24 + $0xc0] sm:$0xff] }
  0xd8   : > { %453 = vrot.lane.b32.xlu1 %v347_v22, %s1659_s28  ;;  %407 = vrot.lane.b32.xlu0 %v308_v24, %s1660_s29 }
  0xda   : > { %v2065_v45 = vpop.permute.xlu1 %533  ;;  %v2067_v48 = vpop.permute.xlu0 %487 }
  0xdc   : > { %641 = vrot.lane.b32.xlu1 %v2061_v43, %s1663_s10  ;;  %595 = vrot.lane.b32.xlu0 %v349_v32, %s1662_s4 }
  0xde   : > { %v722_v55 = vpop.permute.xlu1 %721  ;;  %v676_v56 = vpop.permute.xlu0 %675 }
  0xdf   : > { %v887_v50 = vsel %vm884_vm10, %v870_v54, %v722_v55  ;;  %v871_v9 = vsel %vm867_vm9, %v854_v42, %v676_v56 }
  0xe0   : > { %501 = vrot.lane.b32.xlu1 %v2061_v43, %s1658_s25  ;;  %455 = vrot.lane.b32.xlu0 %v349_v32, %s1659_s28  ;;  %v787_v32 = vsel %vm782_vm4, %v770_v31, %v2038_v26  ;;  %v358_v26 = vrot.slane %v243_v37, 1 }
  0xe1   : > { %1408 = vmatprep.mubr.msk.f32.mxu0 %vm906_vm11, %v887_v50  ;;  %v804_v38 = vsel %vm799_vm5, %v787_v32, %v2047_v33 }
  0xe2   : > { %v2095_v63 = vpop.permute.xlu1 %535  ;;  %v2097_v3 = vpop.permute.xlu0 %393  ;;  %v821_v1 = vsel %vm816_vm6, %v804_v38, %v2065_v45  ;;  %v771_v45 = vsel %vm765_vm3, %v1817_v27, %v2040_v28  ;;  %v360_v55 = vsel %vm273_vm1, %v358_v26, %v359_v23  ;;  %v377_v38 = vrot.slane %v247_v18, 2 }
  0xe3   : > { %v788_v54 = vsel %vm782_vm4, %v771_v45, %v2049_v34 }
  0xe4   : > { %689 = vrot.lane.b32.xlu1 %v311_v61, %s1664_s7  ;;  %643 = vrot.lane.b32.xlu0 %v2070_v2, %s1663_s10  ;;  %v805_v56 = vsel %vm799_vm5, %v788_v54, %v2067_v48 }
  0xe5   : > { %v822_v27 = vsel %vm816_vm6, %v805_v56, %v2095_v63 }
  0xe6   : > { %v724_v10 = vpop.permute.xlu1 %723  ;;  %v582_v11 = vpop.permute.xlu0 %581 }
  0xe7   : > { %v888_v7 = vsel %vm884_vm10, %v871_v9, %v724_v10  ;;  %v838_v25 = vsel %vm833_vm7, %v821_v1, %v582_v11  ;;  %v366_v9 = vrot.slane %v245_v58, 2 }
  0xe8   : > { %549 = vrot.lane.b32.xlu1 %v311_v61, %s1661_s30  ;;  %503 = vrot.lane.b32.xlu0 %v2070_v2, %s1658_s25 }
  0xe9   : > { %1409 = vmatmul.mubr.msk.f32.gmra.mrb[2].mxu0 %vm906_vm11, %v888_v7  ;;  %v367_v7 = vsel %vm314_vm0, %v364_v62, %v366_v9 }
  0xea   : > { %v2117_v12 = vpop.permute.xlu1 %441  ;;  %v2119_v16 = vpop.permute.xlu0 %395 }
  0xec   : > { %737 = vrot.lane.b32.xlu1 %v352_v13, %s1665_s11  ;;  %691 = vrot.lane.b32.xlu0 %v313_v15, %s1664_s7 }
  0xee   : > { %v630_v19 = vpop.permute.xlu1 %629  ;;  %v584_v20 = vpop.permute.xlu0 %583 }
  0xef   : > { %v855_v8 = vsel %vm850_vm8, %v838_v25, %v630_v19  ;;  %v839_v28 = vsel %vm833_vm7, %v822_v27, %v584_v20  ;;  %v246_v19 = vld [vmem:[%s1767_s24 + $0xd8] sm:$0xff]  ;;  %v248_v20 = vld [vmem:[%s1767_s24 + $0xe8] sm:$0x3]  ;;  %s2322_s24 = sand.u32 1, %s1632_s13  }
  0xf0   : > { %551 = vrot.lane.b32.xlu1 %v313_v15, %s1661_s30  ;;  %409 = vrot.lane.b32.xlu0 %v311_v61, %s1660_s29  ;;  %v363_v61 = vrot.slane %v243_v37, 2  ;;  %v379_v26 = vrot.slane %v248_v20, 2 }
  0xf2   : > { %v2126_v22 = vpop.permute.xlu1 %489  ;;  %v2128_v24 = vpop.permute.xlu0 %443  ;;  %v365_v63 = vsel %vm314_vm0, %v363_v61, %v364_v62 }
  0xf4   : > { %739 = vrot.lane.b32.xlu1 %v354_v21, %s1665_s11  ;;  %597 = vrot.lane.b32.xlu0 %v352_v13, %s1662_s4 }
  0xf6   : > { %v678_v29 = vpop.permute.xlu1 %677  ;;  %v632_v30 = vpop.permute.xlu0 %631 }
  0xf7   : > { %v872_v33 = vsel %vm867_vm9, %v855_v8, %v678_v29  ;;  %v856_v34 = vsel %vm850_vm8, %v839_v28, %v632_v30  ;;  %v371_v29 = vrot.slane %v246_v19, 1  ;;  %v374_v30 = vrot.slane %v248_v20, 1 }
  0xf8   : > { %457 = vrot.lane.b32.xlu1 %v352_v13, %s1659_s28  ;;  %411 = vrot.lane.b32.xlu0 %v313_v15, %s1660_s29 }
  0xfa   : > { %v2142_v39 = vpop.permute.xlu1 %537  ;;  %v2144_v40 = vpop.permute.xlu0 %491 }
  0xfc   : > { %645 = vrot.lane.b32.xlu1 %v243_v37, %s1663_s10  ;;  %599 = vrot.lane.b32.xlu0 %v354_v21, %s1662_s4 }
  0xfe   : > { %v726_v35 = vpop.permute.xlu1 %725  ;;  %v680_v41 = vpop.permute.xlu0 %679 }
  0xff   : > { %v889_v53 = vsel %vm884_vm10, %v872_v33, %v726_v35  ;;  %v873_v48 = vsel %vm867_vm9, %v856_v34, %v680_v41  ;;  %v380_v41 = vsel %vm314_vm0, %v377_v38, %v379_v26 }
 0x100   : > { %505 = vrot.lane.b32.xlu1 %v243_v37, %s1658_s25  ;;  %459 = vrot.lane.b32.xlu0 %v354_v21, %s1659_s28  ;;  %v372_v21 = vrot.slane %v247_v18, 1  ;;  %v772_v37 = vsel %vm765_vm3, %v1864_v46, %v2097_v3 }
 0x101   : > { %1411 = vmatprep.mubr.msk.f32.mxu0 %vm906_vm11, %v889_v53  ;;  %v789_v1 = vsel %vm782_vm4, %v772_v37, %v2117_v12 }
 0x102   : > { %v2166_v50 = vpop.permute.xlu1 %539  ;;  %v2168_v57 = vpop.permute.xlu0 %397  ;;  %v375_v25 = vsel %vm273_vm1, %v372_v21, %v374_v30  ;;  %v373_v8 = vsel %vm273_vm1, %v371_v29, %v372_v21  ;;  %v806_v23 = vsel %vm799_vm5, %v789_v1, %v2126_v22 }
 0x103   : > { %v823_v46 = vsel %vm816_vm6, %v806_v23, %v2142_v39  ;;  %v773_v39 = vsel %vm765_vm3, %v1867_v47, %v2119_v16  ;;  %v774_v9 = vsel %vm765_vm3, %v1899_v59, %v2168_v57 }
 0x104   : > { %693 = vrot.lane.b32.xlu1 %v360_v55, %s1664_s7  ;;  %647 = vrot.lane.b32.xlu0 %v244_v44, %s1663_s10  ;;  %v790_v56 = vsel %vm782_vm4, %v773_v39, %v2128_v24 }
 0x105   : > { %v807_v58 = vsel %vm799_vm5, %v790_v56, %v2144_v40 }
 0x106   : > { %v728_v36 = vpop.permute.xlu1 %727  ;;  %v586_v4 = vpop.permute.xlu0 %585  ;;  %v824_v34 = vsel %vm816_vm6, %v807_v58, %v2166_v50 }
 0x107   : > { %v890_v42 = vsel %vm884_vm10, %v873_v48, %v728_v36  ;;  %v840_v3 = vsel %vm833_vm7, %v823_v46, %v586_v4 }
 0x108   : > { %553 = vrot.lane.b32.xlu1 %v360_v55, %s1661_s30  ;;  %507 = vrot.lane.b32.xlu0 %v244_v44, %s1658_s25  ;;  %v376_v44 = vrot.slane %v246_v19, 2  ;;  %s1344_s25 = sshll.u32 %s2322_s24, 7 }
 0x109   : > { %1412 = vmatmul.mubr.msk.f32.gmra.mrb[4].mxu0 %vm906_vm11, %v890_v42  ;;  %s2326_s29 = scalar_lea.vmem [#allocation2], %s1344_s25 }
 0x10a   : > { %v2184_v51 = vpop.permute.xlu1 %445  ;;  %v2186_v6 = vpop.permute.xlu0 %399  ;;  %v378_v53 = vsel %vm314_vm0, %v376_v44, %v377_v38 }
 0x10b   : > { %v775_v59 = vsel %vm765_vm3, %v1902_v60, %v2186_v6 }
 0x10c   : > { %741 = vrot.lane.b32.xlu1 %v365_v63, %s1665_s11  ;;  %695 = vrot.lane.b32.xlu0 %v362_v5, %s1664_s7 }
 0x10e   : > { %v634_v10 = vpop.permute.xlu1 %633  ;;  %v588_v11 = vpop.permute.xlu0 %587 }
 0x10f   : > { %v857_v12 = vsel %vm850_vm8, %v840_v3, %v634_v10  ;;  %v841_v61 = vsel %vm833_vm7, %v824_v34, %v588_v11  ;;  %v791_v10 = vsel %vm782_vm4, %v774_v9, %v2184_v51 }
 0x110   : > { %601 = vrot.lane.b32.xlu1 %v365_v63, %s1662_s4  ;;  %555 = vrot.lane.b32.xlu0 %v362_v5, %s1661_s30  ;;  %s1366_s30 = sshll.u32 %s1644_s16, 1 }
 0x112   : > { %v494_v13 = vpop.permute.xlu1 %493  ;;  %v2193_v15 = vpop.permute.xlu0 %447 }
 0x113   : > { %v808_v11 = vsel %vm799_vm5, %v791_v10, %v494_v13  ;;  %v792_v57 = vsel %vm782_vm4, %v775_v59, %v2193_v15 }
 0x114   : > { %603 = vrot.lane.b32.xlu1 %v367_v7, %s1662_s4  ;;  %743 = vrot.lane.b32.xlu0 %v367_v7, %s1665_s11  ;;  %s2344_s4 = sadd.s32 %s1640_s15, %s1366_s30  ;;  %s1182_s15 = scalar_lea.sflag [#allocation3], %s2322_s24 }
 0x115   : > { %s1373_s20 = sshll.u32 %s2344_s4, 11 }
 0x116   : > { %v682_v31 = vpop.permute.xlu1 %681  ;;  %v636_v32 = vpop.permute.xlu0 %635 }
 0x117   : > { %v874_v45 = vsel %vm867_vm9, %v857_v12, %v682_v31  ;;  %v858_v47 = vsel %vm850_vm8, %v841_v61, %v636_v32 }
 0x118   : > { %651 = vrot.lane.b32.xlu1 %v247_v18, %s1663_s10  ;;  %649 = vrot.lane.b32.xlu0 %v246_v19, %s1663_s10  ;;  %s1202_s10 = sshll.u32 %s2326_s29, 4  ;;  %s2348_s10 = int_to_ptr.vmem [resolvable:$true] %s1202_s10 }
 0x119   : > { %s1530_s16 = scalar_lea.vmem %s2348_s10, 2048  ;;  %p1537_p3 = scmp.lt.s32.totalorder %s2348_s10, %s1535_s9 }
 0x11a   : > { %v542_v33 = vpop.permute.xlu1 %541  ;;  %v496_v35 = vpop.permute.xlu0 %495  ;;  %p1531_p0 = scmp.ne.s32.totalorder %s2348_s10, %s1530_s16 }
 0x11b   : > { %v825_v19 = vsel %vm816_vm6, %v808_v11, %v542_v33  ;;  %v809_v51 = vsel %vm799_vm5, %v792_v57, %v496_v35 }
 0x11c   : > { %699 = vrot.lane.b32.xlu1 %v375_v25, %s1664_s7  ;;  %697 = vrot.lane.b32.xlu0 %v373_v8, %s1664_s7  ;;  %s2353_s7 = scalar_lea.hbm %s2443_s2, %s1373_s20  ;;  %p1532_p1 = pnand %p1531_p0, %p1742_p5 }
 0x11e   : > { %v730_v22 = vpop.permute.xlu1 %729  ;;  %v684_v54 = vpop.permute.xlu0 %683  ;;  %p1533_p2 = pneg %p1532_p1 }
 0x11f   : > { %v891_v55 = vsel %vm884_vm10, %v874_v45, %v730_v22  ;;  %v875_v16 = vsel %vm867_vm9, %v858_v47, %v684_v54 }
 0x120   : > { %747 = vrot.lane.b32.xlu1 %v380_v41, %s1665_s11  ;;  %745 = vrot.lane.b32.xlu0 %v378_v53, %s1665_s11  ;;  %s1536_s11 = scalar_lea.vmem %s1535_s9, 4096 }
 0x121   : > { %1414 = vmatprep.mubr.msk.f32.mxu0 %vm906_vm11, %v891_v55  ;;  %p1538_p4 = scmp.lt.s32.totalorder %s1536_s11, %s1530_s16 }
 0x122   : > { %v544_v27 = vpop.permute.xlu1 %543  ;;  %v402_v28 = vpop.permute.xlu0 %401 }
 0x123   : > { %v826_v38 = vsel %vm816_vm6, %v809_v51, %v544_v27  ;;  %v776_v41 = vsel %vm765_vm3, %v1936_v14, %v402_v28  ;;  %p1539_p6 = por %p1538_p4, %p1537_p3 }
 0x125   : > { %p1540_p8 = pnand %p1539_p6, %p1533_p2 }
 0x126   : > { %v732_v62 = vpop.permute.xlu1 %731  ;;  %v590_v0 = vpop.permute.xlu0 %589 }
 0x127   : > { %v892_v24 = vsel %vm884_vm10, %v875_v16, %v732_v62  ;;  %v842_v20 = vsel %vm833_vm7, %v825_v19, %v590_v0 }
 0x128   : > { %1415 = vmatmul.mubr.msk.f32.gmra.mrb[6].mxu0 %vm906_vm11, %v892_v24 }
 0x12a   : > { %v450_v48 = vpop.permute.xlu1 %449  ;;  %v404_v36 = vpop.permute.xlu0 %403 }
 0x12b   : > { %v793_v53 = vsel %vm782_vm4, %v776_v41, %v450_v48  ;;  %v777_v14 = vsel %vm765_vm3, %v1939_v17, %v404_v36 }
 0x12e   : > { %v638_v40 = vpop.permute.xlu1 %637  ;;  %v592_v4 = vpop.permute.xlu0 %591 }
 0x12f   : > { %v859_v21 = vsel %vm850_vm8, %v842_v20, %v638_v40  ;;  %v843_v44 = vsel %vm833_vm7, %v826_v38, %v592_v4 }
 0x132   : > { %v498_v42 = vpop.permute.xlu1 %497  ;;  %v452_v63 = vpop.permute.xlu0 %451 }
 0x133   : > { %v810_v45 = vsel %vm799_vm5, %v793_v53, %v498_v42  ;;  %v794_v28 = vsel %vm782_vm4, %v777_v14, %v452_v63 }
 0x136   : > { %v686_v5 = vpop.permute.xlu1 %685  ;;  %v640_v50 = vpop.permute.xlu0 %639 }
 0x137   : > { %v876_v29 = vsel %vm867_vm9, %v859_v21, %v686_v5  ;;  %v860_v1 = vsel %vm850_vm8, %v843_v44, %v640_v50 }
 0x13a   : > { %v546_v7 = vpop.permute.xlu1 %545  ;;  %v500_v18 = vpop.permute.xlu0 %499 }
 0x13b   : > { %v827_v55 = vsel %vm816_vm6, %v810_v45, %v546_v7  ;;  %v811_v47 = vsel %vm799_vm5, %v794_v28, %v500_v18 }
 0x13e   : > { %v734_v30 = vpop.permute.xlu1 %733  ;;  %v688_v31 = vpop.permute.xlu0 %687 }
 0x13f   : > { %v893_v32 = vsel %vm884_vm10, %v876_v29, %v734_v30  ;;  %v877_v25 = vsel %vm867_vm9, %v860_v1, %v688_v31 }
 0x140   : > { %1417 = vmatprep.mubr.msk.f32.mxu1 %vm906_vm11, %v893_v32 }
 0x142   : > { %v548_v13 = vpop.permute.xlu1 %547  ;;  %v406_v37 = vpop.permute.xlu0 %405 }
 0x143   : > { %v828_v0 = vsel %vm816_vm6, %v811_v47, %v548_v13  ;;  %v778_v18 = vsel %vm765_vm3, %v1986_v49, %v406_v37 }
 0x146   : > { %v736_v8 = vpop.permute.xlu1 %735  ;;  %v594_v26 = vpop.permute.xlu0 %593 }
 0x147   : > { %v894_v60 = vsel %vm884_vm10, %v877_v25, %v736_v8  ;;  %v844_v39 = vsel %vm833_vm7, %v827_v55, %v594_v26 }
 0x148   : > { %1418 = vmatmul.mubr.msk.f32.vlgmr.msra.gmra.mrb[0].mxu1 %vm906_vm11, %v894_v60 }
 0x14a   : > { %v454_v6 = vpop.permute.xlu1 %453  ;;  %v408_v15 = vpop.permute.xlu0 %407 }
 0x14b   : > { %v795_v19 = vsel %vm782_vm4, %v778_v18, %v454_v6  ;;  %v779_v49 = vsel %vm765_vm3, %v1994_v52, %v408_v15 }
 0x14e   : > { %v642_v23 = vpop.permute.xlu1 %641  ;;  %v596_v33 = vpop.permute.xlu0 %595 }
 0x14f   : > { %v861_v56 = vsel %vm850_vm8, %v844_v39, %v642_v23  ;;  %v845_v24 = vsel %vm833_vm7, %v828_v0, %v596_v33 }
 0x152   : > { %v502_v35 = vpop.permute.xlu1 %501  ;;  %v456_v46 = vpop.permute.xlu0 %455 }
 0x153   : > { %v812_v20 = vsel %vm799_vm5, %v795_v19, %v502_v35  ;;  %v796_v37 = vsel %vm782_vm4, %v779_v49, %v456_v46 }
 0x156   : > { %v690_v3 = vpop.permute.xlu1 %689  ;;  %v644_v12 = vpop.permute.xlu0 %643 }
 0x157   : > { %v878_v58 = vsel %vm867_vm9, %v861_v56, %v690_v3  ;;  %v862_v48 = vsel %vm850_vm8, %v845_v24, %v644_v12 }
 0x15a   : > { %v550_v22 = vpop.permute.xlu1 %549  ;;  %v504_v54 = vpop.permute.xlu0 %503 }
 0x15b   : > { %v829_v30 = vsel %vm816_vm6, %v812_v20, %v550_v22  ;;  %v813_v38 = vsel %vm799_vm5, %v796_v37, %v504_v54 }
 0x15e   : > { %v738_v27 = vpop.permute.xlu1 %737  ;;  %v692_v34 = vpop.permute.xlu0 %691 }
 0x15f   : > { %v895_v61 = vsel %vm884_vm10, %v878_v58, %v738_v27  ;;  %v879_v40 = vsel %vm867_vm9, %v862_v48, %v692_v34 }
 0x160   : > { %1420 = vmatprep.mubr.msk.f32.mxu1 %vm906_vm11, %v895_v61 }
 0x162   : > { %v552_v16 = vpop.permute.xlu1 %551  ;;  %v410_v62 = vpop.permute.xlu0 %409 }
 0x163   : > { %v830_v25 = vsel %vm816_vm6, %v813_v38, %v552_v16  ;;  %v780_v35 = vsel %vm765_vm3, %v2061_v43, %v410_v62 }
 0x166   : > { %v740_v4 = vpop.permute.xlu1 %739  ;;  %v598_v42 = vpop.permute.xlu0 %597 }
 0x167   : > { %v896_v17 = vsel %vm884_vm10, %v879_v40, %v740_v4  ;;  %v846_v31 = vsel %vm833_vm7, %v829_v30, %v598_v42 }
 0x168   : > { %1421 = vmatmul.mubr.msk.f32.gmra.mrb[2].mxu1 %vm906_vm11, %v896_v17 }
 0x16a   : > { %v458_v36 = vpop.permute.xlu1 %457  ;;  %v412_v63 = vpop.permute.xlu0 %411 }
 0x16b   : > { %v781_v46 = vsel %vm765_vm3, %v2070_v2, %v412_v63  ;;  %v797_v3 = vsel %vm782_vm4, %v780_v35, %v458_v36 }
 0x16e   : > { %v646_v5 = vpop.permute.xlu1 %645  ;;  %v600_v50 = vpop.permute.xlu0 %599 }
 0x16f   : > { %v863_v32 = vsel %vm850_vm8, %v846_v31, %v646_v5  ;;  %v847_v8 = vsel %vm833_vm7, %v830_v25, %v600_v50 }
 0x172   : > { %v506_v9 = vpop.permute.xlu1 %505  ;;  %v460_v10 = vpop.permute.xlu0 %459 }
 0x173   : > { %v798_v12 = vsel %vm782_vm4, %v781_v46, %v460_v10  ;;  %v814_v41 = vsel %vm799_vm5, %v797_v3, %v506_v9 }
 0x176   : > { %v694_v11 = vpop.permute.xlu1 %693  ;;  %v648_v7 = vpop.permute.xlu0 %647 }
 0x177   : > { %v880_v59 = vsel %vm867_vm9, %v863_v32, %v694_v11  ;;  %v864_v26 = vsel %vm850_vm8, %v847_v8, %v648_v7 }
 0x17a   : > { %v554_v21 = vpop.permute.xlu1 %553  ;;  %v508_v29 = vpop.permute.xlu0 %507 }
 0x17b   : > { %v815_v53 = vsel %vm799_vm5, %v798_v12, %v508_v29  ;;  %v831_v54 = vsel %vm816_vm6, %v814_v41, %v554_v21 }
 0x17e   : > { %v742_v57 = vpop.permute.xlu1 %741  ;;  %v696_v51 = vpop.permute.xlu0 %695 }
 0x17f   : > { %v897_v13 = vsel %vm884_vm10, %v880_v59, %v742_v57  ;;  %v881_v60 = vsel %vm867_vm9, %v864_v26, %v696_v51 }
 0x180   : > { %1423 = vmatprep.mubr.msk.f32.mxu1 %vm906_vm11, %v897_v13 }
 0x182   : > { %v602_v44 = vpop.permute.xlu1 %601  ;;  %v556_v1 = vpop.permute.xlu0 %555 }
 0x183   : > { %v832_v55 = vsel %vm816_vm6, %v815_v53, %v556_v1  ;;  %v848_v43 = vsel %vm833_vm7, %v831_v54, %v602_v44 }
 0x186   : > { %v604_v6 = vpop.permute.xlu1 %603  ;;  %v744_v23 = vpop.permute.xlu0 %743 }
 0x187   : > { %v898_v52 = vsel %vm884_vm10, %v881_v60, %v744_v23  ;;  %v849_v39 = vsel %vm833_vm7, %v832_v55, %v604_v6 }
 0x188   : > { %1424 = vmatmul.mubr.msk.f32.gmra.mrb[4].mxu1 %vm906_vm11, %v898_v52 }
 0x18a   : > { %v652_v15 = vpop.permute.xlu1 %651  ;;  %v650_v33 = vpop.permute.xlu0 %649 }
 0x18b   : > { %v866_v2 = vsel %vm850_vm8, %v849_v39, %v652_v15  ;;  %v865_v56 = vsel %vm850_vm8, %v848_v43, %v650_v33 }
 0x18e   : > { %v700_v45 = vpop.permute.xlu1 %699  ;;  %v698_v22 = vpop.permute.xlu0 %697 }
 0x18f   : > { %v883_v58 = vsel %vm867_vm9, %v866_v2, %v700_v45  ;;  %v882_v27 = vsel %vm867_vm9, %v865_v56, %v698_v22 }
 0x192   : > { %v748_v34 = vpop.permute.xlu1 %747  ;;  %v746_v61 = vpop.permute.xlu0 %745 }
 0x193   : > { %v900_v14 = vsel %vm884_vm10, %v883_v58, %v748_v34  ;;  %v899_v28 = vsel %vm884_vm10, %v882_v27, %v746_v61 }
 0x194   : > { %1426 = vmatprep.mubr.msk.f32.mxu1 %vm906_vm11, %v899_v28 }
 0x195   : > { %1427 = vmatmul.mubr.msk.f32.gmra.mrb[6].mxu1 %vm906_vm11, %v900_v14 }
 0x19c   : > { %v1407_v47 = vpop.f32.mrb[0].mxu0 }
 0x19d   : > { %1105 = vst [vmem:[%s2326_s29 + $0x8] sm:$0xff] %v1407_v47  ;;  %v1142_v16 = vmul.f32 %v1407_v47, %v1407_v47  ;;  %v1025_v62 = vpop.f32.mrb[1].mxu0 }
 0x19e   : > { %1104 = vst [vmem:[%s2326_s29] sm:$0xff] %v1025_v62  ;;  %v1120_v0 = vadd.f32 %v1407_v47, %v1025_v62  ;;  %v1141_v24 = vmul.f32 %v1025_v62, %v1025_v62 }
 0x1a0   : > { %v1157_v48 = vadd.f32 %v1142_v16, %v1141_v24 }
 0x1bc   : > { %v1410_v40 = vpop.f32.mrb[2].mxu0 }
 0x1bd   : > { %1107 = vst [vmem:[%s2326_s29 + $0x18] sm:$0xff] %v1410_v40  ;;  %v1035_v4 = vpop.f32.mrb[3].mxu0  ;;  %v1144_v36 = vmul.f32 %v1410_v40, %v1410_v40 }
 0x1be   : > { %1106 = vst [vmem:[%s2326_s29 + $0x10] sm:$0xff] %v1035_v4  ;;  %v1121_v42 = vadd.f32 %v1120_v0, %v1035_v4  ;;  %v1143_v17 = vmul.f32 %v1035_v4, %v1035_v4 }
 0x1c0   : > { %v1158_v63 = vadd.f32 %v1157_v48, %v1143_v17  ;;  %v1122_v5 = vadd.f32 %v1410_v40, %v1121_v42 }
 0x1c2   : > { %v1159_v50 = vadd.f32 %v1158_v63, %v1144_v36 }
 0x1dc   : > { %v1413_v9 = vpop.f32.mrb[4].mxu0 }
 0x1dd   : > { %1109 = vst [vmem:[%s2326_s29 + $0x28] sm:$0xff] %v1413_v9  ;;  %v1045_v10 = vpop.f32.mrb[5].mxu0  ;;  %v1146_v18 = vmul.f32 %v1413_v9, %v1413_v9 }
 0x1de   : > { %1108 = vst [vmem:[%s2326_s29 + $0x20] sm:$0xff] %v1045_v10  ;;  %v1123_v11 = vadd.f32 %v1122_v5, %v1045_v10  ;;  %v1145_v7 = vmul.f32 %v1045_v10, %v1045_v10 }
 0x1e0   : > { %v1160_v19 = vadd.f32 %v1159_v50, %v1145_v7  ;;  %v1124_v20 = vadd.f32 %v1413_v9, %v1123_v11 }
 0x1e2   : > { %v1161_v21 = vadd.f32 %v1160_v19, %v1146_v18 }
 0x1fb   : > { %v1416_v29 = vpop.f32.mrb[6].mxu0 }
 0x1fc   : > { %1111 = vst [vmem:[%s2326_s29 + $0x38] sm:$0xff] %v1416_v29  ;;  %v1055_v30 = vpop.f32.mrb[7].mxu0  ;;  %v1148_v59 = vmul.f32 %v1416_v29, %v1416_v29 }
 0x1fd   : > { %1110 = vst [vmem:[%s2326_s29 + $0x30] sm:$0xff] %v1055_v30  ;;  %v1125_v31 = vadd.f32 %v1124_v20, %v1055_v30  ;;  %v1147_v32 = vmul.f32 %v1055_v30, %v1055_v30 }
 0x1ff   : > { %v1126_v57 = vadd.f32 %v1416_v29, %v1125_v31  ;;  %v1162_v51 = vadd.f32 %v1161_v21, %v1147_v32 }
 0x201   : > { %v1163_v13 = vadd.f32 %v1162_v51, %v1148_v59 }
 0x21b   : > { %v1419_v49 = vpop.f32.mrb[0].mxu1 }
 0x21c   : > { %1113 = vst [vmem:[%s2326_s29 + $0x48] sm:$0xff] %v1419_v49  ;;  %v1065_v37 = vpop.f32.mrb[1].mxu1  ;;  %v1150_v1 = vmul.f32 %v1419_v49, %v1419_v49 }
 0x21d   : > { %1112 = vst [vmem:[%s2326_s29 + $0x40] sm:$0xff] %v1065_v37  ;;  %v1127_v38 = vadd.f32 %v1126_v57, %v1065_v37  ;;  %v1149_v44 = vmul.f32 %v1065_v37, %v1065_v37 }
 0x21f   : > { %v1164_v25 = vadd.f32 %v1163_v13, %v1149_v44  ;;  %v1128_v8 = vadd.f32 %v1419_v49, %v1127_v38 }
 0x221   : > { %v1165_v26 = vadd.f32 %v1164_v25, %v1150_v1 }
 0x23b   : > { %v1422_v60 = vpop.f32.mrb[2].mxu1 }
 0x23c   : > { %1115 = vst [vmem:[%s2326_s29 + $0x58] sm:$0xff] %v1422_v60  ;;  %v1075_v6 = vpop.f32.mrb[3].mxu1  ;;  %v1152_v15 = vmul.f32 %v1422_v60, %v1422_v60 }
 0x23d   : > { %1114 = vst [vmem:[%s2326_s29 + $0x50] sm:$0xff] %v1075_v6  ;;  %v1129_v23 = vadd.f32 %v1128_v8, %v1075_v6  ;;  %v1151_v52 = vmul.f32 %v1075_v6, %v1075_v6 }
 0x23f   : > { %v1166_v33 = vadd.f32 %v1165_v26, %v1151_v52  ;;  %v1130_v35 = vadd.f32 %v1422_v60, %v1129_v23 }
 0x241   : > { %v1167_v46 = vadd.f32 %v1166_v33, %v1152_v15 }
 0x25b   : > { %v1425_v3 = vpop.f32.mrb[4].mxu1 }
 0x25c   : > { %1117 = vst [vmem:[%s2326_s29 + $0x68] sm:$0xff] %v1425_v3  ;;  %v1085_v12 = vpop.f32.mrb[5].mxu1  ;;  %v1154_v45 = vmul.f32 %v1425_v3, %v1425_v3 }
 0x25d   : > { %1116 = vst [vmem:[%s2326_s29 + $0x60] sm:$0xff] %v1085_v12  ;;  %v1131_v41 = vadd.f32 %v1130_v35, %v1085_v12  ;;  %v1153_v53 = vmul.f32 %v1085_v12, %v1085_v12 }
 0x25f   : > { %v1168_v22 = vadd.f32 %v1167_v46, %v1153_v53  ;;  %v1132_v54 = vadd.f32 %v1425_v3, %v1131_v41 }
 0x261   : > { %v1169_v55 = vadd.f32 %v1168_v22, %v1154_v45 }
 0x268   : > { %v1428_v43 = vpop.f32.mrb[6].mxu1 }
 0x269   : > { %1119 = vst [vmem:[%s2326_s29 + $0x78] sm:$0xff] %v1428_v43  ;;  %v1095_v39 = vpop.f32.mrb[7].mxu1 }
 0x26a   : > { %1118 = vst [vmem:[%s2326_s29 + $0x70] sm:$0xff] %v1095_v39  ;;  %v1133_v2 = vadd.f32 %v1132_v54, %v1095_v39  ;;  %v1155_v56 = vmul.f32 %v1095_v39, %v1095_v39 }
 0x26b   : > { %1543 = shalt.err (!%p1540_p8)
}
 0x26c   : > { %s1544_s25 = scalar_lea.hbm %s2353_s7, 2048  ;;  %s1548_s20 = scalar_lea.hbm %s2443_s2, 8192 }
 0x26d   : > { %p1545_p9 = scmp.ne.s32.totalorder %s2353_s7, %s1544_s25  ;;  %p1549_p12 = scmp.lt.u32.totalorder %s2353_s7, %s2443_s2 }
 0x26e   : > { %p1550_p13 = scmp.lt.u32.totalorder %s1548_s20, %s1544_s25  ;;  %p1552_p1 = scmp.lt.u32.totalorder %s1544_s25, %s2353_s7 }
 0x26f   : > { %p1546_p10 = pnand %p1545_p9, %p1742_p5 }
 0x270   : > { %p1551_p0 = por %p1550_p13, %p1549_p12 }
 0x271   : > { %p1547_p11 = pneg %p1546_p10 }
 0x272   : > { %p1553_p2 = por %p1552_p1, %p1551_p0 }
 0x274   : > { %p1554_p3 = pnand %p1553_p2, %p1547_p11 }
 0x276   : > { %1557 = shalt.err (!%p1554_p3)
}
 0x277   : > { %s1667_s16 = smov 128   ;;  %v1156_v58 = vmul.f32 %v1428_v43, %v1428_v43  ;;  %v1134_v27 = vadd.f32 %v1428_v43, %v1133_v2  ;;  %v1170_v34 = vadd.f32 %v1169_v55, %v1155_v56  ;;  %s1345_s8 = sshll.u32 %s2322_s24, 1  ;;  %vm1178_vm12 = vcmask 1040384  }
 0x278   : > { %1445 = dma.vmem_to_hbm [thread:$0]  (%p1742_p5), %s2348_s10, 2048, %s2353_s7, %s1182_s15, %s1667_s16, %s1667_s16, %s1659_s28  }
 0x279   : > { %v1135_v61 = vrot.slane %v1134_v27, 4  ;;  %v1171_v14 = vadd.f32 %v1170_v34, %v1156_v58  ;;  %s1370_s9 = sshll.u32 %s2344_s4, 5  ;;  %s204_s28 = scalar_lea.vmem [#allocation4], %s1345_s8 }
 0x27a   : > { %s1220_s10 = sshll.u32 %s204_s28, 4  ;;  %s2387_s11 = scalar_lea.hbm %s2444_s3, %s1370_s9  ;;  %s2389_s10 = int_to_ptr.vmem [resolvable:$true] %s1220_s10 }
 0x27b   : > { %v1136_v28 = vadd.f32 %v1135_v61, %v1134_v27  ;;  %v1172_v47 = vrot.slane %v1171_v14, 4  ;;  %s1187_s25 = scalar_lea.sflag [#allocation5], %s2322_s24  ;;  %s1558_s29 = scalar_lea.vmem %s2389_s10, 32 }
 0x27c   : > { %p1559_p4 = scmp.ne.s32.totalorder %s2389_s10, %s1558_s29  ;;  %s1668_s4 = smov [#allocation4]  }
 0x27d   : > { %v1137_v16 = vrot.slane %v1136_v28, 2  ;;  %v1173_v62 = vadd.f32 %v1172_v47, %v1171_v14  ;;  %s1562_s30 = sshll.u32 %s1668_s4, 4  ;;  %s1563_s30 = int_to_ptr.vmem [resolvable:$false] %s1562_s30 }
 0x27e   : > { %p1560_p6 = pnand %p1559_p4, %p1742_p5  ;;  %s1564_s20 = scalar_lea.vmem %s1563_s30, 64 }
 0x27f   : > { %v1138_v0 = vadd.f32 %v1137_v16, %v1136_v28  ;;  %v1174_v24 = vrot.slane %v1173_v62, 2  ;;  %p1565_p9 = scmp.lt.s32.totalorder %s2389_s10, %s1563_s30  ;;  %p1566_p10 = scmp.lt.s32.totalorder %s1564_s20, %s1558_s29 }
 0x280   : > { %p1561_p8 = pneg %p1560_p6 }
 0x281   : > { %v1139_v48 = vrot.slane %v1138_v0, 1  ;;  %v1175_v40 = vadd.f32 %v1174_v24, %v1173_v62  ;;  %p1567_p11 = por %p1566_p10, %p1565_p9 }
 0x283   : > { %v1176_v4 = vrot.slane %v1175_v40, 1  ;;  %v1140_v42 = vadd.f32 %v1139_v48, %v1138_v0  ;;  %p1568_p12 = pnand %p1567_p11, %p1561_p8 }
 0x285   : > { %v1177_v17 = vadd.f32 %v1176_v4, %v1175_v40 }
 0x287   : > { %v1179_v36 = vsel %vm1178_vm12, %v1140_v42, %v1177_v17 }
 0x288   : > { %1180 = vst [vmem:[%s204_s28] sm:$0x3] %v1179_v36 }
 0x289   : > { %1571 = shalt.err (!%p1568_p12)
}
 0x28a   : > { %s1572_s24 = scalar_lea.hbm %s2387_s11, 32  ;;  %s1576_s16 = scalar_lea.hbm %s2444_s3, 128 }
 0x28b   : > { %p1573_p13 = scmp.ne.s32.totalorder %s2387_s11, %s1572_s24  ;;  %p1577_p2 = scmp.lt.u32.totalorder %s2387_s11, %s2444_s3 }
 0x28c   : > { %p1578_p3 = scmp.lt.u32.totalorder %s1576_s16, %s1572_s24  ;;  %p1580_p6 = scmp.lt.u32.totalorder %s1572_s24, %s2387_s11 }
 0x28d   : > { %p1574_p0 = pnand %p1573_p13, %p1742_p5 }
 0x28e   : > { %p1579_p4 = por %p1578_p3, %p1577_p2 }
 0x28f   : > { %p1575_p1 = pneg %p1574_p0 }
 0x290   : > { %p1581_p8 = por %p1580_p6, %p1579_p4 }
 0x292   : > { %p1582_p9 = pnand %p1581_p8, %p1575_p1 }
 0x294   : > { %1585 = shalt.err (!%p1582_p9)
}
 0x295   : > { %1446 = dma.vmem_to_hbm [thread:$0]  (%p1742_p5), %s2389_s10, 32, %s2387_s11, %s1187_s25  }
 0x296 PF: > { %p1456_p10 = scmp.ge.s32.totalorder %s1656_s19, 2  ;;  %s1232_s28 = sand.u32 1, %s1628_s12  }
 0x297   : > { %s1233_s7 = scalar_lea.sflag [#allocation3], %s1232_s28 }
 0x298   : > { %p1450_p11 = pnand %p1456_p10, %p1748_p7 }
 0x29a   : > { %1619 = dma.done.wait (!%p1450_p11), %s1233_s7, 2048  }
 0x29b   : > { %1621 = vsyncadd (!%p1450_p11), %s1233_s7, 4294965248  ;;  %s1242_s15 = scalar_lea.sflag [#allocation5], %s1232_s28 }
 0x29c   : > { %1623 = dma.done.wait (!%p1450_p11), %s1242_s15, 32  }
 0x29d   : > { %1625 = vsyncadd (!%p1450_p11), %s1242_s15, 4294967264  ;;  %s20_s19 = sadd.s32 1, %s1656_s19   ;;  %s2447_s12 = smov %s1632_s13 }
 0x29e   : > { %p17_p12 = scmp.ge.s32.totalorder %s20_s19, 6   ;;  %s2448_s13 = smov %s1636_s14 }
 0x29f   : > { %s2449_s14 = smov %s1758_s5  ;;  %s2450_s15 = smov %s1648_s17 }
 0x2a0   : > { %s2451_s16 = smov %s1652_s18  ;;  %s2452_s17 = smov %s2455_s21 }
 0x2a1   : > { %s2453_s18 = smov %s2459_s22  ;;  %19 = sbr.rel (!%p17_p12) target bundleno = 7 (0x7), region = 80 }
 0x2a8   :  { %1247 = vsyncpa [#allocation3], 1 }
 0x2a9   :  { %1249 = vsyncpa [#allocation3 + $0x1], 1 }
 0x2aa   :  { %1250 = vsyncpa [#allocation5], 1 }
 0x2ab   :  { %1252 = vsyncpa [#allocation5 + $0x1], 1 }

</bundles_post_ra>
